<compile_context>
chip_gen: v7x
topology: tpu7x:2x2x1
jax: 0.10.0
libtpu: 0.0.40
codegen_flags: <defaults>
</compile_context>

<pallas_src>
import functools

import jax
import jax.numpy as jnp
from jax.experimental import pallas as pl
from jax.experimental.pallas import tpu as pltpu

_LANE = 128      # lane width (last-dim granularity)
_SUBLANE = 8     # sublane granularity (second-to-last dim)


def _round_up(x, m):
    return ((x + m - 1) // m) * m


def _tpu_generation():
    """Best-effort TPU generation detection (4/5/6/7); conservative default."""
    try:
        kind = jax.devices()[0].device_kind.lower()
    except Exception:
        return 7  # most conservative limits (fit every generation)
    for gen in (7, 6, 5, 4):
        if f"v{gen}" in kind:
            return gen
    return 7


def _mlp_kernel(*refs, num_layers):
    # refs = (x_ref, w0_ref, b0_ref, w1_ref, b1_ref, ..., o_ref)
    x_ref = refs[0]
    o_ref = refs[-1]
    wb = refs[1:-1]
    h = x_ref[...]                                   # bf16 [tm, d0_pad]
    for l in range(num_layers):
        w = wb[2 * l][...]                           # bf16 [d_in_pad, d_out_pad] (K, N)
        b = wb[2 * l + 1][...]                       # f32  [1, d_out_pad]
        # MXU: bf16 x bf16 -> f32 accumulate; epilogue (bias + ReLU) in f32 on
        # the VALU/VPU (slack while MXU is busy), single downcast per layer.
        acc = jnp.dot(h, w, preferred_element_type=jnp.float32) + b
        if l < num_layers - 1:
            h = jnp.maximum(acc, 0.0).astype(jnp.bfloat16)
        else:
            h = acc                                  # final layer stays f32
    o_ref[...] = h.astype(o_ref.dtype)


def mlp_forward(x, params, *, single_buffer_weights=True):
    """x: [batch, d_in]; params: list of (w [d_in, d_out], b [d_out])."""
    batch, d_in = x.shape
    num_layers = len(params)
    gen = _tpu_generation()

    # Feature padding granularity: 256 on v6e/v7x (2x 256x256 MXU) for dims
    # that already exceed one lane-group; 128 otherwise (v5e 4x 128x128 MXU).
    def pad_dim(d):
        if gen >= 6 and d > _LANE:
            return _round_up(d, 2 * _LANE)
        return _round_up(d, _LANE)

    dims = [d_in] + [w.shape[1] for (w, _) in params]
    dims_pad = [pad_dim(d) for d in dims]

    # Batch tile: multiple of 8 sublanes.  For batch > 16 ensure >= 2 grid
    # steps so both v7x TensorCores are used; allow larger tiles on v5e/v6e
    # (128 MiB VMEM) to amortize the ~0.35 us per-step overhead.
    tm_cap = 256 if gen >= 7 else 512
    if batch > 16:
        tm = min(tm_cap, _round_up(-(-batch // 2), _SUBLANE))
    else:
        tm = max(_SUBLANE, _round_up(batch, _SUBLANE))
    batch_pad = _round_up(batch, tm)

    # Zero-pad + cast the activation input to bf16 (layout/dtype plumbing
    # outside the kernel; padding is sliced off at the end).
    x_p = jnp.pad(x, ((0, batch_pad - batch), (0, dims_pad[0] - dims[0])))
    x_p = x_p.astype(jnp.bfloat16)

    weight_pipeline = {}
    if single_buffer_weights:
        # Constant index_map -> never re-fetched across the grid; a single VMEM
        # buffer halves the resident-weight footprint vs default double-buffer.
        weight_pipeline = dict(pipeline_mode=pl.Buffered(buffer_count=1))

    flat_inputs = [x_p]
    in_specs = [pl.BlockSpec((tm, dims_pad[0]), lambda i: (i, 0))]
    for l, (w, b) in enumerate(params):
        k_p, n_p = dims_pad[l], dims_pad[l + 1]
        w_p = jnp.pad(w, ((0, k_p - w.shape[0]), (0, n_p - w.shape[1])))
        b_p = jnp.pad(b, (0, n_p - b.shape[0])).reshape(1, n_p)
        flat_inputs += [w_p.astype(jnp.bfloat16), b_p.astype(jnp.float32)]
        # TODO(synk): for layers too large to stay VMEM-resident (notably v7x's
        # 64 MiB VMEM), add a K-tiled grid axis with an f32 VMEM accumulator
        # (bias/ReLU under pl.when(k == last)) or stream K-slabs from HBM
        # (memory_space=pl.ANY + pltpu.emit_pipeline) instead of whole-weight
        # residency.
        in_specs += [
            pl.BlockSpec((k_p, n_p), lambda i: (0, 0), **weight_pipeline),
            pl.BlockSpec((1, n_p), lambda i: (0, 0), **weight_pipeline),
        ]

    n_out = dims[-1]
    n_out_pad = dims_pad[-1]

    flops = 2 * batch_pad * sum(dims_pad[l] * dims_pad[l + 1]
                                for l in range(num_layers))
    bytes_accessed = (sum(int(a.size) * a.dtype.itemsize for a in flat_inputs)
                      + batch_pad * n_out_pad * x.dtype.itemsize)

    # Scoped-VMEM ceiling: defaults (16/32 MiB) are far below physical; leave
    # headroom below 64 MiB on v7x, use ~100 MiB on v5e/v6e (128 MiB physical).
    vmem_limit = (56 << 20) if gen >= 7 else (100 << 20)

    out = pl.pallas_call(
        functools.partial(_mlp_kernel, num_layers=num_layers),
        out_shape=jax.ShapeDtypeStruct((batch_pad, n_out_pad), x.dtype),
        grid_spec=pltpu.PrefetchScalarGridSpec(
            num_scalar_prefetch=0,
            grid=(batch_pad // tm,),
            in_specs=in_specs,
            out_specs=pl.BlockSpec((tm, n_out_pad), lambda i: (i, 0)),
        ),
        compiler_params=pltpu.CompilerParams(
            dimension_semantics=("parallel",),
            vmem_limit_bytes=vmem_limit),
        cost_estimate=pl.CostEstimate(
            flops=flops, transcendentals=0, bytes_accessed=int(bytes_accessed)),
    )(*flat_inputs)
    return out[:batch, :n_out]


def init_mlp_params(key, d_in, d_outs, dtype=jnp.float32):
    """Xavier-uniform weights (stored [d_in, d_out] = K,N), zero biases.

    Mirrors torch.nn.init.xavier_uniform_ on Linear(d_in, d_out).weight
    (limit = sqrt(6/(fan_in+fan_out))) and zeros_ on the bias.
    """
    params = []
    fan_in = d_in
    for d_out in d_outs:
        key, sub = jax.random.split(key)
        limit = (6.0 / (fan_in + d_out)) ** 0.5
        w = jax.random.uniform(sub, (fan_in, d_out), dtype=dtype,
                               minval=-limit, maxval=limit)
        b = jnp.zeros((d_out,), dtype=dtype)
        params.append((w, b))
        fan_in = d_out
    return params


def mlp_reference_f32(x, params):
    n = len(params)
    for i, (w, b) in enumerate(params):
        x = x @ w + b
        if i < n - 1:
            x = jnp.maximum(x, 0.0)
    return x


def mlp_reference_bf16(x, params):
    """Emulates the kernel's dtype strategy: bf16 MXU inputs, f32 accumulation."""
    n = len(params)
    h = x.astype(jnp.bfloat16)
    for i, (w, b) in enumerate(params):
        acc = jnp.dot(h, w.astype(jnp.bfloat16),
                      preferred_element_type=jnp.float32) + b.astype(jnp.float32)
        if i < n - 1:
            h = jnp.maximum(acc, 0.0).astype(jnp.bfloat16)
        else:
            h = acc
    return h.astype(x.dtype)


if __name__ == "__main__":
    key = jax.random.PRNGKey(0)
    batch, d_in = 8, 32
    d_outs = [64, 48, 16]

    k_x, k_p = jax.random.split(key)
    x = jax.random.normal(k_x, (batch, d_in), dtype=jnp.float32)
    params = init_mlp_params(k_p, d_in, d_outs)

    def run(single_buffer):
        fwd = jax.jit(functools.partial(mlp_forward,
                                        single_buffer_weights=single_buffer))
        return jax.block_until_ready(fwd(x, params))

    try:
        out = run(True)
    except Exception:
        # Fallback only in case pl.Buffered(buffer_count=1) (single-buffered
        # resident weights) is rejected by this jax/Mosaic build; everything
        # else (bf16 MXU path, tiling, vmem limit) is identical.
        out = run(False)

    assert out.shape == (batch, d_outs[-1])
    # Tight check vs a reference that uses the same bf16-input / f32-accumulate
    # recipe, plus a loose sanity check vs the pure-f32 reference.
    assert jnp.allclose(out, mlp_reference_bf16(x, params), atol=1e-2, rtol=1e-2)
    assert jnp.allclose(out, mlp_reference_f32(x, params), atol=1e-1, rtol=1e-1)
    print("KERNEL_OK")
</pallas_src>

<mosaic_0001>
module attributes {stable_mosaic.version = 11 : i64} {
  func.func @_mlp_kernel(%arg0: i32, %arg1: memref<8x128xbf16, #tpu.memory_space<vmem>>, %arg2: memref<128x128xbf16, #tpu.memory_space<vmem>>, %arg3: memref<1x128xf32, #tpu.memory_space<vmem>>, %arg4: memref<128x128xbf16, #tpu.memory_space<vmem>>, %arg5: memref<1x128xf32, #tpu.memory_space<vmem>>, %arg6: memref<128x128xbf16, #tpu.memory_space<vmem>>, %arg7: memref<1x128xf32, #tpu.memory_space<vmem>>, %arg8: memref<8x128xf32, #tpu.memory_space<vmem>>) attributes {dimension_semantics = [#tpu.dimension_semantics<parallel>], iteration_bounds = array<i64: 1>, scalar_prefetch = 0 : i64, scratch_operands = 0 : i64, tpu.core_type = #tpu.core_type<tc>, window_params = [{transform_indices = @transform_0, window_bounds = array<i64: 8, 128>}, {pipeline_mode = #tpu.pipeline_mode<synchronous>, transform_indices = @transform_1, window_bounds = array<i64: 128, 128>}, {pipeline_mode = #tpu.pipeline_mode<synchronous>, transform_indices = @transform_2, window_bounds = array<i64: 1, 128>}, {pipeline_mode = #tpu.pipeline_mode<synchronous>, transform_indices = @transform_3, window_bounds = array<i64: 128, 128>}, {pipeline_mode = #tpu.pipeline_mode<synchronous>, transform_indices = @transform_4, window_bounds = array<i64: 1, 128>}, {pipeline_mode = #tpu.pipeline_mode<synchronous>, transform_indices = @transform_5, window_bounds = array<i64: 128, 128>}, {pipeline_mode = #tpu.pipeline_mode<synchronous>, transform_indices = @transform_6, window_bounds = array<i64: 1, 128>}, {transform_indices = @transform_7, window_bounds = array<i64: 8, 128>}]} {
    %c0 = arith.constant 0 : index
    %c0_0 = arith.constant 0 : index
    %0 = vector.load %arg1[%c0, %c0_0] : memref<8x128xbf16, #tpu.memory_space<vmem>>, vector<8x128xbf16>
    %c0_1 = arith.constant 0 : index
    %c0_2 = arith.constant 0 : index
    %1 = vector.load %arg2[%c0_1, %c0_2] : memref<128x128xbf16, #tpu.memory_space<vmem>>, vector<128x128xbf16>
    %c0_3 = arith.constant 0 : index
    %c0_4 = arith.constant 0 : index
    %2 = vector.load %arg3[%c0_3, %c0_4] : memref<1x128xf32, #tpu.memory_space<vmem>>, vector<1x128xf32>
    %cst = arith.constant dense<0.000000e+00> : vector<8x128xf32>
    %3 = tpu.matmul %0, %1, %cst {dimension_numbers = #tpu.dot_dimension_numbers<[1], [0], [0], [1], [0, 0, 1, 1], [], []>} : vector<8x128xbf16>, vector<128x128xbf16>, vector<8x128xf32> -> vector<8x128xf32>
    %4 = vector.broadcast %2 : vector<1x128xf32> to vector<8x128xf32>
    %5 = arith.addf %3, %4 : vector<8x128xf32>
    %cst_5 = arith.constant 0.000000e+00 : f32
    %6 = vector.broadcast %cst_5 : f32 to vector<8x128xf32>
    %7 = arith.maximumf %5, %6 : vector<8x128xf32>
    %8 = arith.truncf %7 : vector<8x128xf32> to vector<8x128xbf16>
    %c0_6 = arith.constant 0 : index
    %c0_7 = arith.constant 0 : index
    %9 = vector.load %arg4[%c0_6, %c0_7] : memref<128x128xbf16, #tpu.memory_space<vmem>>, vector<128x128xbf16>
    %c0_8 = arith.constant 0 : index
    %c0_9 = arith.constant 0 : index
    %10 = vector.load %arg5[%c0_8, %c0_9] : memref<1x128xf32, #tpu.memory_space<vmem>>, vector<1x128xf32>
    %cst_10 = arith.constant dense<0.000000e+00> : vector<8x128xf32>
    %11 = tpu.matmul %8, %9, %cst_10 {dimension_numbers = #tpu.dot_dimension_numbers<[1], [0], [0], [1], [0, 0, 1, 1], [], []>} : vector<8x128xbf16>, vector<128x128xbf16>, vector<8x128xf32> -> vector<8x128xf32>
    %12 = vector.broadcast %10 : vector<1x128xf32> to vector<8x128xf32>
    %13 = arith.addf %11, %12 : vector<8x128xf32>
    %cst_11 = arith.constant 0.000000e+00 : f32
    %14 = vector.broadcast %cst_11 : f32 to vector<8x128xf32>
    %15 = arith.maximumf %13, %14 : vector<8x128xf32>
    %16 = arith.truncf %15 : vector<8x128xf32> to vector<8x128xbf16>
    %c0_12 = arith.constant 0 : index
    %c0_13 = arith.constant 0 : index
    %17 = vector.load %arg6[%c0_12, %c0_13] : memref<128x128xbf16, #tpu.memory_space<vmem>>, vector<128x128xbf16>
    %c0_14 = arith.constant 0 : index
    %c0_15 = arith.constant 0 : index
    %18 = vector.load %arg7[%c0_14, %c0_15] : memref<1x128xf32, #tpu.memory_space<vmem>>, vector<1x128xf32>
    %cst_16 = arith.constant dense<0.000000e+00> : vector<8x128xf32>
    %19 = tpu.matmul %16, %17, %cst_16 {dimension_numbers = #tpu.dot_dimension_numbers<[1], [0], [0], [1], [0, 0, 1, 1], [], []>} : vector<8x128xbf16>, vector<128x128xbf16>, vector<8x128xf32> -> vector<8x128xf32>
    %20 = vector.broadcast %18 : vector<1x128xf32> to vector<8x128xf32>
    %21 = arith.addf %19, %20 : vector<8x128xf32>
    %c0_17 = arith.constant 0 : index
    %c0_18 = arith.constant 0 : index
    %22 = vector.load %arg8[%c0_17, %c0_18] : memref<8x128xf32, #tpu.memory_space<vmem>>, vector<8x128xf32>
    tpu.vector_store %arg8[%c0_17, %c0_18], %21 {strides = array<i32>} : memref<8x128xf32, #tpu.memory_space<vmem>>, vector<8x128xf32>,
    return
  }
  func.func @transform_0(%arg0: i32) -> (i32, i32) {
    %c0_i32 = arith.constant 0 : i32
    %c0_i32_0 = arith.constant 0 : i32
    return %arg0, %c0_i32 : i32, i32
  }
  func.func @transform_1(%arg0: i32) -> (i32, i32) {
    %c0_i32 = arith.constant 0 : i32
    %c0_i32_0 = arith.constant 0 : i32
    %c0_i32_1 = arith.constant 0 : i32
    return %c0_i32, %c0_i32_0 : i32, i32
  }
  func.func @transform_2(%arg0: i32) -> (i32, i32) {
    %c0_i32 = arith.constant 0 : i32
    %c0_i32_0 = arith.constant 0 : i32
    %c0_i32_1 = arith.constant 0 : i32
    return %c0_i32, %c0_i32_0 : i32, i32
  }
  func.func @transform_3(%arg0: i32) -> (i32, i32) {
    %c0_i32 = arith.constant 0 : i32
    %c0_i32_0 = arith.constant 0 : i32
    %c0_i32_1 = arith.constant 0 : i32
    return %c0_i32, %c0_i32_0 : i32, i32
  }
  func.func @transform_4(%arg0: i32) -> (i32, i32) {
    %c0_i32 = arith.constant 0 : i32
    %c0_i32_0 = arith.constant 0 : i32
    %c0_i32_1 = arith.constant 0 : i32
    return %c0_i32, %c0_i32_0 : i32, i32
  }
  func.func @transform_5(%arg0: i32) -> (i32, i32) {
    %c0_i32 = arith.constant 0 : i32
    %c0_i32_0 = arith.constant 0 : i32
    %c0_i32_1 = arith.constant 0 : i32
    return %c0_i32, %c0_i32_0 : i32, i32
  }
  func.func @transform_6(%arg0: i32) -> (i32, i32) {
    %c0_i32 = arith.constant 0 : i32
    %c0_i32_0 = arith.constant 0 : i32
    %c0_i32_1 = arith.constant 0 : i32
    return %c0_i32, %c0_i32_0 : i32, i32
  }
  func.func @transform_7(%arg0: i32) -> (i32, i32) {
    %c0_i32 = arith.constant 0 : i32
    %c0_i32_0 = arith.constant 0 : i32
    return %arg0, %c0_i32 : i32, i32
  }
}

module attributes {stable_mosaic.version = 11 : i64} {
  func.func @_mlp_kernel(%arg0: i32, %arg1: memref<8x128xbf16, #tpu.memory_space<vmem>>, %arg2: memref<128x128xbf16, #tpu.memory_space<vmem>>, %arg3: memref<1x128xf32, #tpu.memory_space<vmem>>, %arg4: memref<128x128xbf16, #tpu.memory_space<vmem>>, %arg5: memref<1x128xf32, #tpu.memory_space<vmem>>, %arg6: memref<128x128xbf16, #tpu.memory_space<vmem>>, %arg7: memref<1x128xf32, #tpu.memory_space<vmem>>, %arg8: memref<8x128xf32, #tpu.memory_space<vmem>>) attributes {dimension_semantics = [#tpu.dimension_semantics<parallel>], iteration_bounds = array<i64: 1>, scalar_prefetch = 0 : i64, scratch_operands = 0 : i64, tpu.core_type = #tpu.core_type<tc>, window_params = [{transform_indices = @transform_0, window_bounds = array<i64: 8, 128>}, {pipeline_mode = #tpu.pipeline_mode<synchronous>, transform_indices = @transform_1, window_bounds = array<i64: 128, 128>}, {pipeline_mode = #tpu.pipeline_mode<synchronous>, transform_indices = @transform_2, window_bounds = array<i64: 1, 128>}, {pipeline_mode = #tpu.pipeline_mode<synchronous>, transform_indices = @transform_3, window_bounds = array<i64: 128, 128>}, {pipeline_mode = #tpu.pipeline_mode<synchronous>, transform_indices = @transform_4, window_bounds = array<i64: 1, 128>}, {pipeline_mode = #tpu.pipeline_mode<synchronous>, transform_indices = @transform_5, window_bounds = array<i64: 128, 128>}, {pipeline_mode = #tpu.pipeline_mode<synchronous>, transform_indices = @transform_6, window_bounds = array<i64: 1, 128>}, {transform_indices = @transform_7, window_bounds = array<i64: 8, 128>}]} {
    %c0 = arith.constant 0 : index
    %c0_0 = arith.constant 0 : index
    %0 = vector.load %arg1[%c0, %c0_0] : memref<8x128xbf16, #tpu.memory_space<vmem>>, vector<8x128xbf16>
    %c0_1 = arith.constant 0 : index
    %c0_2 = arith.constant 0 : index
    %1 = vector.load %arg2[%c0_1, %c0_2] : memref<128x128xbf16, #tpu.memory_space<vmem>>, vector<128x128xbf16>
    %c0_3 = arith.constant 0 : index
    %c0_4 = arith.constant 0 : index
    %2 = vector.load %arg3[%c0_3, %c0_4] : memref<1x128xf32, #tpu.memory_space<vmem>>, vector<1x128xf32>
    %cst = arith.constant dense<0.000000e+00> : vector<8x128xf32>
    %3 = tpu.matmul %0, %1, %cst {dimension_numbers = #tpu.dot_dimension_numbers<[1], [0], [0], [1], [0, 0, 1, 1], [], []>} : vector<8x128xbf16>, vector<128x128xbf16>, vector<8x128xf32> -> vector<8x128xf32>
    %4 = vector.broadcast %2 : vector<1x128xf32> to vector<8x128xf32>
    %5 = arith.addf %3, %4 : vector<8x128xf32>
    %cst_5 = arith.constant 0.000000e+00 : f32
    %6 = vector.broadcast %cst_5 : f32 to vector<8x128xf32>
    %7 = arith.maximumf %5, %6 : vector<8x128xf32>
    %8 = arith.truncf %7 : vector<8x128xf32> to vector<8x128xbf16>
    %c0_6 = arith.constant 0 : index
    %c0_7 = arith.constant 0 : index
    %9 = vector.load %arg4[%c0_6, %c0_7] : memref<128x128xbf16, #tpu.memory_space<vmem>>, vector<128x128xbf16>
    %c0_8 = arith.constant 0 : index
    %c0_9 = arith.constant 0 : index
    %10 = vector.load %arg5[%c0_8, %c0_9] : memref<1x128xf32, #tpu.memory_space<vmem>>, vector<1x128xf32>
    %cst_10 = arith.constant dense<0.000000e+00> : vector<8x128xf32>
    %11 = tpu.matmul %8, %9, %cst_10 {dimension_numbers = #tpu.dot_dimension_numbers<[1], [0], [0], [1], [0, 0, 1, 1], [], []>} : vector<8x128xbf16>, vector<128x128xbf16>, vector<8x128xf32> -> vector<8x128xf32>
    %12 = vector.broadcast %10 : vector<1x128xf32> to vector<8x128xf32>
    %13 = arith.addf %11, %12 : vector<8x128xf32>
    %cst_11 = arith.constant 0.000000e+00 : f32
    %14 = vector.broadcast %cst_11 : f32 to vector<8x128xf32>
    %15 = arith.maximumf %13, %14 : vector<8x128xf32>
    %16 = arith.truncf %15 : vector<8x128xf32> to vector<8x128xbf16>
    %c0_12 = arith.constant 0 : index
    %c0_13 = arith.constant 0 : index
    %17 = vector.load %arg6[%c0_12, %c0_13] : memref<128x128xbf16, #tpu.memory_space<vmem>>, vector<128x128xbf16>
    %c0_14 = arith.constant 0 : index
    %c0_15 = arith.constant 0 : index
    %18 = vector.load %arg7[%c0_14, %c0_15] : memref<1x128xf32, #tpu.memory_space<vmem>>, vector<1x128xf32>
    %cst_16 = arith.constant dense<0.000000e+00> : vector<8x128xf32>
    %19 = tpu.matmul %16, %17, %cst_16 {dimension_numbers = #tpu.dot_dimension_numbers<[1], [0], [0], [1], [0, 0, 1, 1], [], []>} : vector<8x128xbf16>, vector<128x128xbf16>, vector<8x128xf32> -> vector<8x128xf32>
    %20 = vector.broadcast %18 : vector<1x128xf32> to vector<8x128xf32>
    %21 = arith.addf %19, %20 : vector<8x128xf32>
    %c0_17 = arith.constant 0 : index
    %c0_18 = arith.constant 0 : index
    %22 = vector.load %arg8[%c0_17, %c0_18] : memref<8x128xf32, #tpu.memory_space<vmem>>, vector<8x128xf32>
    tpu.vector_store %arg8[%c0_17, %c0_18], %21 {strides = array<i32>} : memref<8x128xf32, #tpu.memory_space<vmem>>, vector<8x128xf32>,
    return
  }
  func.func @transform_0(%arg0: i32) -> (i32, i32) {
    %c0_i32 = arith.constant 0 : i32
    %c0_i32_0 = arith.constant 0 : i32
    return %arg0, %c0_i32 : i32, i32
  }
  func.func @transform_1(%arg0: i32) -> (i32, i32) {
    %c0_i32 = arith.constant 0 : i32
    %c0_i32_0 = arith.constant 0 : i32
    %c0_i32_1 = arith.constant 0 : i32
    return %c0_i32, %c0_i32_0 : i32, i32
  }
  func.func @transform_2(%arg0: i32) -> (i32, i32) {
    %c0_i32 = arith.constant 0 : i32
    %c0_i32_0 = arith.constant 0 : i32
    %c0_i32_1 = arith.constant 0 : i32
    return %c0_i32, %c0_i32_0 : i32, i32
  }
  func.func @transform_3(%arg0: i32) -> (i32, i32) {
    %c0_i32 = arith.constant 0 : i32
    %c0_i32_0 = arith.constant 0 : i32
    %c0_i32_1 = arith.constant 0 : i32
    return %c0_i32, %c0_i32_0 : i32, i32
  }
  func.func @transform_4(%arg0: i32) -> (i32, i32) {
    %c0_i32 = arith.constant 0 : i32
    %c0_i32_0 = arith.constant 0 : i32
    %c0_i32_1 = arith.constant 0 : i32
    return %c0_i32, %c0_i32_0 : i32, i32
  }
  func.func @transform_5(%arg0: i32) -> (i32, i32) {
    %c0_i32 = arith.constant 0 : i32
    %c0_i32_0 = arith.constant 0 : i32
    %c0_i32_1 = arith.constant 0 : i32
    return %c0_i32, %c0_i32_0 : i32, i32
  }
  func.func @transform_6(%arg0: i32) -> (i32, i32) {
    %c0_i32 = arith.constant 0 : i32
    %c0_i32_0 = arith.constant 0 : i32
    %c0_i32_1 = arith.constant 0 : i32
    return %c0_i32, %c0_i32_0 : i32, i32
  }
  func.func @transform_7(%arg0: i32) -> (i32, i32) {
    %c0_i32 = arith.constant 0 : i32
    %c0_i32_0 = arith.constant 0 : i32
    return %arg0, %c0_i32 : i32, i32
  }
}

</mosaic_0001>

<bundles_post_ra>
// kernel: mlp_forward.1
= control target key start
LH: loop header
LB: loop body
LE: loop exit
PB: predicated region body
PF: predicated region fallthrough
CT: control target
= control target key end

     0   :  { %v546_v1 = vmov 0.0   ;;  %vm547_vm0 = vmmov 0   ;;  %s715_s0 = inlined_call_operand.vmem [shape: bf16[8,128], index: 0, kind: input, shape index: {}]   ;;  %s716_s1 = inlined_call_operand.vmem [shape: bf16[128,128], index: 1, kind: input, shape index: {}]   ;;  %s717_s2 = inlined_call_operand.vmem [shape: f32[1,128], index: 2, kind: input, shape index: {}]   ;;  %s718_s3 = inlined_call_operand.vmem [shape: bf16[128,128], index: 3, kind: input, shape index: {}]   ;;  %s719_s4 = inlined_call_operand.vmem [shape: f32[1,128], index: 4, kind: input, shape index: {}]   ;;  %s720_s5 = inlined_call_operand.vmem [shape: bf16[128,128], index: 5, kind: input, shape index: {}]   ;;  %s721_s6 = inlined_call_operand.vmem [shape: f32[1,128], index: 6, kind: input, shape index: {}]   ;;  %s722_s7 = inlined_call_operand.hbm [shape: f32[8,128], index: 7, kind: output, shape index: {}]  }
   0x1   :  { %v498_v0 = vld [vmem:[%s716_s1] sm:$0xff]   ;;  %435 = vmatprep.subr.bf16.mxu0 %v546_v1  ;;  %455 = vmatprep.subr.bf16.mxu1 %v546_v1  ;;  %v499_v2 = vld [vmem:[%s716_s1 + $0x8] sm:$0xff]   ;;  %v500_v3 = vld [vmem:[%s716_s1 + $0x10] sm:$0xff]  }
   0x2   :  { %436 = vmatpush3.bf16.msra.mxu0 %v498_v0  ;;  %451 = vmatprep.mubr.msk.bf16.mxu0 %vm547_vm0, %v546_v1  ;;  %v506_v4 = vld [vmem:[%s718_s3] sm:$0xff]   ;;  %v501_v5 = vld [vmem:[%s716_s1 + $0x18] sm:$0xff]   ;;  %v507_v6 = vld [vmem:[%s718_s3 + $0x8] sm:$0xff]  }
   0x3   :  { %437 = vmatprep.subr.bf16.mxu0 %v546_v1  ;;  %471 = vmatprep.mubr.msk.bf16.mxu1 %vm547_vm0, %v546_v1  ;;  %v502_v7 = vld [vmem:[%s716_s1 + $0x20] sm:$0xff]   ;;  %v508_v8 = vld [vmem:[%s718_s3 + $0x10] sm:$0xff]   ;;  %v503_v9 = vld [vmem:[%s716_s1 + $0x28] sm:$0xff]  }
   0x4   :  { %456 = vmatpush3.bf16.msra.mxu1 %v506_v4  ;;  %v509_v10 = vld [vmem:[%s718_s3 + $0x18] sm:$0xff]  }
   0x5   :  { %457 = vmatprep.subr.bf16.mxu1 %v546_v1 }
   0x6   :  { %438 = vmatpush3.bf16.msra.mxu0 %v499_v2 }
   0x7   :  { %439 = vmatprep.subr.bf16.mxu0 %v546_v1 }
   0x8   :  { %458 = vmatpush3.bf16.msra.mxu1 %v507_v6 }
   0x9   :  { %459 = vmatprep.subr.bf16.mxu1 %v546_v1 }
   0xa   :  { %440 = vmatpush3.bf16.msra.mxu0 %v500_v3 }
   0xb   :  { %441 = vmatprep.subr.bf16.mxu0 %v546_v1 }
   0xc   :  { %460 = vmatpush3.bf16.msra.mxu1 %v508_v8 }
   0xd   :  { %461 = vmatprep.subr.bf16.mxu1 %v546_v1 }
   0xe   :  { %442 = vmatpush3.bf16.msra.mxu0 %v501_v5 }
   0xf   :  { %443 = vmatprep.subr.bf16.mxu0 %v546_v1 }
  0x12   :  { %444 = vmatpush3.bf16.msra.mxu0 %v502_v7 }
  0x13   :  { %445 = vmatprep.subr.bf16.mxu0 %v546_v1 }
  0x14   :  { %12 = vsyncpa [#allocation3], 0  ;;  %v504_v11 = vld [vmem:[%s716_s1 + $0x30] sm:$0xff]   ;;  %462 = vmatpush3.bf16.msra.mxu1 %v509_v10  ;;  %v510_v12 = vld [vmem:[%s718_s3 + $0x20] sm:$0xff]   ;;  %s548_s30 = smov [#allocation2]  }
  0x15   :  { %463 = vmatprep.subr.bf16.mxu1 %v546_v1  ;;  %v505_v13 = vld [vmem:[%s716_s1 + $0x38] sm:$0xff]   ;;  %v511_v14 = vld [vmem:[%s718_s3 + $0x28] sm:$0xff]   ;;  %v28_v15 = vld [vmem:[%s715_s0] sm:$0xf]  ;;  %s373_s1 = sshll.u32 %s548_s30, 4  ;;  %s374_s1 = int_to_ptr.vmem [resolvable:$true] %s373_s1 }
  0x16   :  { %446 = vmatpush3.bf16.msra.mxu0 %v503_v9  ;;  %v512_v16 = vld [vmem:[%s718_s3 + $0x30] sm:$0xff]   ;;  %v513_v17 = vld [vmem:[%s718_s3 + $0x38] sm:$0xff]   ;;  %v514_v18 = vld [vmem:[%s720_s5] sm:$0xff]   ;;  %p527_p1 = scmp.lt.s32.totalorder %s374_s1, %s374_s1 }
  0x17   :  { %447 = vmatprep.subr.bf16.mxu0 %v546_v1  ;;  %v515_v19 = vld [vmem:[%s720_s5 + $0x8] sm:$0xff]   ;;  %v516_v20 = vld [vmem:[%s720_s5 + $0x10] sm:$0xff]   ;;  %v517_v21 = vld [vmem:[%s720_s5 + $0x18] sm:$0xff]  }
  0x18   :  { %464 = vmatpush3.bf16.msra.mxu1 %v510_v12  ;;  %v518_v22 = vld [vmem:[%s720_s5 + $0x20] sm:$0xff]   ;;  %v519_v23 = vld [vmem:[%s720_s5 + $0x28] sm:$0xff]   ;;  %v520_v32 = vld [vmem:[%s720_s5 + $0x30] sm:$0xff]  }
  0x19   :  { %465 = vmatprep.subr.bf16.mxu1 %v546_v1  ;;  %v381_v24 = vld [vmem:[%s717_s2] ss:$0 sm:$0xff]  ;;  %v521_v33 = vld [vmem:[%s720_s5 + $0x38] sm:$0xff]  }
  0x1a   :  { %448 = vmatpush3.bf16.msra.mxu0 %v504_v11  ;;  %v390_v34 = vld [vmem:[%s719_s4] ss:$0 sm:$0xff]  ;;  %s522_s4 = scalar_lea.vmem %s374_s1, 128 }
  0x1b   :  { %449 = vmatprep.subr.bf16.mxu0 %v546_v1  ;;  %v399_v42 = vld [vmem:[%s721_s6] ss:$0 sm:$0xff]  ;;  %p523_p0 = scmp.ne.s32.totalorder %s374_s1, %s522_s4  ;;  %p528_p2 = scmp.lt.s32.totalorder %s522_s4, %s522_s4 }
  0x1c   :  { %466 = vmatpush3.bf16.msra.mxu1 %v511_v14 }
  0x1d   :  { %467 = vmatprep.subr.bf16.mxu1 %v546_v1  ;;  %p529_p3 = por %p528_p2, %p527_p1 }
  0x1e   :  { %450 = vmatpush3.bf16.msra.mxu0 %v505_v13 }
  0x1f   :  { %475 = vmatprep.subr.bf16.mxu0 %v546_v1  ;;  %p530_p4 = pnand %p529_p3, %p523_p0 }
  0x20   :  { %468 = vmatpush3.bf16.msra.mxu1 %v512_v16 }
  0x21   :  { %452 = vmatmul.mubr.bf16.vlgmr.msra.gmra.mrb[0].mxu0 %v28_v15  ;;  %469 = vmatprep.subr.bf16.mxu1 %v546_v1 }
  0x22   :  { %491 = vmatprep.mubr.msk.bf16.mxu0 %vm547_vm0, %v546_v1  ;;  %476 = vmatpush3.bf16.msra.mxu0 %v514_v18 }
  0x23   :  { %477 = vmatprep.subr.bf16.mxu0 %v546_v1 }
  0x24   :  { %470 = vmatpush3.bf16.msra.mxu1 %v513_v17 }
  0x26   :  { %478 = vmatpush3.bf16.msra.mxu0 %v515_v19 }
  0x27   :  { %479 = vmatprep.subr.bf16.mxu0 %v546_v1 }
  0x2a   :  { %480 = vmatpush3.bf16.msra.mxu0 %v516_v20 }
  0x2b   :  { %481 = vmatprep.subr.bf16.mxu0 %v546_v1 }
  0x2e   :  { %482 = vmatpush3.bf16.msra.mxu0 %v517_v21 }
  0x2f   :  { %483 = vmatprep.subr.bf16.mxu0 %v546_v1 }
  0x32   :  { %484 = vmatpush3.bf16.msra.mxu0 %v518_v22 }
  0x33   :  { %485 = vmatprep.subr.bf16.mxu0 %v546_v1 }
  0x36   :  { %486 = vmatpush3.bf16.msra.mxu0 %v519_v23 }
  0x37   :  { %487 = vmatprep.subr.bf16.mxu0 %v546_v1 }
  0x3a   :  { %488 = vmatpush3.bf16.msra.mxu0 %v520_v32 }
  0x3b   :  { %489 = vmatprep.subr.bf16.mxu0 %v546_v1 }
  0x3e   :  { %490 = vmatpush3.bf16.msra.mxu0 %v521_v33 }
  0xf4   :  { %v134_v25 = vpop.f32.mrb[0].mxu0 }
  0xf5   :  { %v135_v26 = vadd.f32 %v381_v24, %v134_v25  ;;  %v453_v27 = vpop.f32.mrb[1].mxu0 }
  0xf6   :  { %v137_v28 = vpop.f32.mrb[2].mxu0 }
  0xf7   :  { %v140_v29 = vmax.f32 %v135_v26, 0.0  ;;  %v454_v30 = vpop.f32.mrb[3].mxu0 }
  0xf9   :  { %v141_v31 = vpack.c.bf16 %v140_v29, %v140_v29 }
  0xfb   :  { %472 = vmatmul.mubr.bf16.vlgmr.msra.gmra.mrb[0].mxu1 %v141_v31 }
 0x1ce   :  { %v247_v35 = vpop.f32.mrb[0].mxu1 }
 0x1cf   :  { %v248_v36 = vadd.f32 %v390_v34, %v247_v35  ;;  %v473_v37 = vpop.f32.mrb[1].mxu1 }
 0x1d0   :  { %v250_v38 = vpop.f32.mrb[2].mxu1 }
 0x1d1   :  { %v253_v39 = vmax.f32 %v248_v36, 0.0  ;;  %v474_v40 = vpop.f32.mrb[3].mxu1 }
 0x1d3   :  { %v254_v41 = vpack.c.bf16 %v253_v39, %v253_v39 }
 0x1d5   :  { %492 = vmatmul.mubr.bf16.vlgmr.msra.gmra.mrb[4].mxu0 %v254_v41 }
 0x2a8   :  { %v360_v43 = vpop.f32.mrb[4].mxu0 }
 0x2a9   :  { %v361_v44 = vadd.f32 %v399_v42, %v360_v43  ;;  %v493_v45 = vpop.f32.mrb[5].mxu0 }
 0x2aa   :  { %v363_v46 = vpop.f32.mrb[6].mxu0 }
 0x2ab   :  { %366 = vst [vmem:[#allocation2] sm:$0xff] %v361_v44  ;;  %v494_v47 = vpop.f32.mrb[7].mxu0 }
 0x2ac   :  { %533 = shalt.err (!%p530_p4)
}
 0x2ad   :  { %s534_s6 = scalar_lea.hbm %s722_s7, 128 }
 0x2ae   :  { %p535_p5 = scmp.ne.s32.totalorder %s722_s7, %s534_s6  ;;  %p538_p6 = scmp.lt.u32.totalorder %s534_s6, %s722_s7 }
 0x2b0   :  { %p540_p7 = pnand %p538_p6, %p535_p5 }
 0x2b2   :  { %543 = shalt.err (!%p540_p7)
}
 0x2b3   :  { %376 = dma.vmem_to_hbm [thread:$0]  %s374_s1, 128, %s722_s7, [#allocation3]  }
 0x2b4   :  { %544 = dma.done.wait [#allocation3], 128  }
 0x2b5   :  { %545 = vsyncadd [#allocation3], 4294967168 }
 0x2b6   :  { %380 = vsyncpa [#allocation3], 1 }

// kernel: mlp_forward.1
= control target key start
LH: loop header
LB: loop body
LE: loop exit
PB: predicated region body
PF: predicated region fallthrough
CT: control target
= control target key end

     0   :  { %v546_v1 = vmov 0.0   ;;  %vm547_vm0 = vmmov 0   ;;  %s715_s0 = inlined_call_operand.vmem [shape: bf16[8,128], index: 0, kind: input, shape index: {}]   ;;  %s716_s1 = inlined_call_operand.vmem [shape: bf16[128,128], index: 1, kind: input, shape index: {}]   ;;  %s717_s2 = inlined_call_operand.vmem [shape: f32[1,128], index: 2, kind: input, shape index: {}]   ;;  %s718_s3 = inlined_call_operand.vmem [shape: bf16[128,128], index: 3, kind: input, shape index: {}]   ;;  %s719_s4 = inlined_call_operand.vmem [shape: f32[1,128], index: 4, kind: input, shape index: {}]   ;;  %s720_s5 = inlined_call_operand.vmem [shape: bf16[128,128], index: 5, kind: input, shape index: {}]   ;;  %s721_s6 = inlined_call_operand.vmem [shape: f32[1,128], index: 6, kind: input, shape index: {}]   ;;  %s722_s7 = inlined_call_operand.hbm [shape: f32[8,128], index: 7, kind: output, shape index: {}]  }
   0x1   :  { %v498_v0 = vld [vmem:[%s716_s1] sm:$0xff]   ;;  %435 = vmatprep.subr.bf16.mxu0 %v546_v1  ;;  %455 = vmatprep.subr.bf16.mxu1 %v546_v1  ;;  %v499_v2 = vld [vmem:[%s716_s1 + $0x8] sm:$0xff]   ;;  %v500_v3 = vld [vmem:[%s716_s1 + $0x10] sm:$0xff]  }
   0x2   :  { %436 = vmatpush3.bf16.msra.mxu0 %v498_v0  ;;  %451 = vmatprep.mubr.msk.bf16.mxu0 %vm547_vm0, %v546_v1  ;;  %v506_v4 = vld [vmem:[%s718_s3] sm:$0xff]   ;;  %v501_v5 = vld [vmem:[%s716_s1 + $0x18] sm:$0xff]   ;;  %v507_v6 = vld [vmem:[%s718_s3 + $0x8] sm:$0xff]  }
   0x3   :  { %437 = vmatprep.subr.bf16.mxu0 %v546_v1  ;;  %471 = vmatprep.mubr.msk.bf16.mxu1 %vm547_vm0, %v546_v1  ;;  %v502_v7 = vld [vmem:[%s716_s1 + $0x20] sm:$0xff]   ;;  %v508_v8 = vld [vmem:[%s718_s3 + $0x10] sm:$0xff]   ;;  %v503_v9 = vld [vmem:[%s716_s1 + $0x28] sm:$0xff]  }
   0x4   :  { %456 = vmatpush3.bf16.msra.mxu1 %v506_v4  ;;  %v509_v10 = vld [vmem:[%s718_s3 + $0x18] sm:$0xff]  }
   0x5   :  { %457 = vmatprep.subr.bf16.mxu1 %v546_v1 }
   0x6   :  { %438 = vmatpush3.bf16.msra.mxu0 %v499_v2 }
   0x7   :  { %439 = vmatprep.subr.bf16.mxu0 %v546_v1 }
   0x8   :  { %458 = vmatpush3.bf16.msra.mxu1 %v507_v6 }
   0x9   :  { %459 = vmatprep.subr.bf16.mxu1 %v546_v1 }
   0xa   :  { %440 = vmatpush3.bf16.msra.mxu0 %v500_v3 }
   0xb   :  { %441 = vmatprep.subr.bf16.mxu0 %v546_v1 }
   0xc   :  { %460 = vmatpush3.bf16.msra.mxu1 %v508_v8 }
   0xd   :  { %461 = vmatprep.subr.bf16.mxu1 %v546_v1 }
   0xe   :  { %442 = vmatpush3.bf16.msra.mxu0 %v501_v5 }
   0xf   :  { %443 = vmatprep.subr.bf16.mxu0 %v546_v1 }
  0x12   :  { %444 = vmatpush3.bf16.msra.mxu0 %v502_v7 }
  0x13   :  { %445 = vmatprep.subr.bf16.mxu0 %v546_v1 }
  0x14   :  { %12 = vsyncpa [#allocation3], 0  ;;  %v504_v11 = vld [vmem:[%s716_s1 + $0x30] sm:$0xff]   ;;  %462 = vmatpush3.bf16.msra.mxu1 %v509_v10  ;;  %v510_v12 = vld [vmem:[%s718_s3 + $0x20] sm:$0xff]   ;;  %s548_s30 = smov [#allocation2]  }
  0x15   :  { %463 = vmatprep.subr.bf16.mxu1 %v546_v1  ;;  %v505_v13 = vld [vmem:[%s716_s1 + $0x38] sm:$0xff]   ;;  %v511_v14 = vld [vmem:[%s718_s3 + $0x28] sm:$0xff]   ;;  %v28_v15 = vld [vmem:[%s715_s0] sm:$0xf]  ;;  %s373_s1 = sshll.u32 %s548_s30, 4  ;;  %s374_s1 = int_to_ptr.vmem [resolvable:$true] %s373_s1 }
  0x16   :  { %446 = vmatpush3.bf16.msra.mxu0 %v503_v9  ;;  %v512_v16 = vld [vmem:[%s718_s3 + $0x30] sm:$0xff]   ;;  %v513_v17 = vld [vmem:[%s718_s3 + $0x38] sm:$0xff]   ;;  %v514_v18 = vld [vmem:[%s720_s5] sm:$0xff]   ;;  %p527_p1 = scmp.lt.s32.totalorder %s374_s1, %s374_s1 }
  0x17   :  { %447 = vmatprep.subr.bf16.mxu0 %v546_v1  ;;  %v515_v19 = vld [vmem:[%s720_s5 + $0x8] sm:$0xff]   ;;  %v516_v20 = vld [vmem:[%s720_s5 + $0x10] sm:$0xff]   ;;  %v517_v21 = vld [vmem:[%s720_s5 + $0x18] sm:$0xff]  }
  0x18   :  { %464 = vmatpush3.bf16.msra.mxu1 %v510_v12  ;;  %v518_v22 = vld [vmem:[%s720_s5 + $0x20] sm:$0xff]   ;;  %v519_v23 = vld [vmem:[%s720_s5 + $0x28] sm:$0xff]   ;;  %v520_v32 = vld [vmem:[%s720_s5 + $0x30] sm:$0xff]  }
  0x19   :  { %465 = vmatprep.subr.bf16.mxu1 %v546_v1  ;;  %v381_v24 = vld [vmem:[%s717_s2] ss:$0 sm:$0xff]  ;;  %v521_v33 = vld [vmem:[%s720_s5 + $0x38] sm:$0xff]  }
  0x1a   :  { %448 = vmatpush3.bf16.msra.mxu0 %v504_v11  ;;  %v390_v34 = vld [vmem:[%s719_s4] ss:$0 sm:$0xff]  ;;  %s522_s4 = scalar_lea.vmem %s374_s1, 128 }
  0x1b   :  { %449 = vmatprep.subr.bf16.mxu0 %v546_v1  ;;  %v399_v42 = vld [vmem:[%s721_s6] ss:$0 sm:$0xff]  ;;  %p523_p0 = scmp.ne.s32.totalorder %s374_s1, %s522_s4  ;;  %p528_p2 = scmp.lt.s32.totalorder %s522_s4, %s522_s4 }
  0x1c   :  { %466 = vmatpush3.bf16.msra.mxu1 %v511_v14 }
  0x1d   :  { %467 = vmatprep.subr.bf16.mxu1 %v546_v1  ;;  %p529_p3 = por %p528_p2, %p527_p1 }
  0x1e   :  { %450 = vmatpush3.bf16.msra.mxu0 %v505_v13 }
  0x1f   :  { %475 = vmatprep.subr.bf16.mxu0 %v546_v1  ;;  %p530_p4 = pnand %p529_p3, %p523_p0 }
  0x20   :  { %468 = vmatpush3.bf16.msra.mxu1 %v512_v16 }
  0x21   :  { %452 = vmatmul.mubr.bf16.vlgmr.msra.gmra.mrb[0].mxu0 %v28_v15  ;;  %469 = vmatprep.subr.bf16.mxu1 %v546_v1 }
  0x22   :  { %491 = vmatprep.mubr.msk.bf16.mxu0 %vm547_vm0, %v546_v1  ;;  %476 = vmatpush3.bf16.msra.mxu0 %v514_v18 }
  0x23   :  { %477 = vmatprep.subr.bf16.mxu0 %v546_v1 }
  0x24   :  { %470 = vmatpush3.bf16.msra.mxu1 %v513_v17 }
  0x26   :  { %478 = vmatpush3.bf16.msra.mxu0 %v515_v19 }
  0x27   :  { %479 = vmatprep.subr.bf16.mxu0 %v546_v1 }
  0x2a   :  { %480 = vmatpush3.bf16.msra.mxu0 %v516_v20 }
  0x2b   :  { %481 = vmatprep.subr.bf16.mxu0 %v546_v1 }
  0x2e   :  { %482 = vmatpush3.bf16.msra.mxu0 %v517_v21 }
  0x2f   :  { %483 = vmatprep.subr.bf16.mxu0 %v546_v1 }
  0x32   :  { %484 = vmatpush3.bf16.msra.mxu0 %v518_v22 }
  0x33   :  { %485 = vmatprep.subr.bf16.mxu0 %v546_v1 }
  0x36   :  { %486 = vmatpush3.bf16.msra.mxu0 %v519_v23 }
  0x37   :  { %487 = vmatprep.subr.bf16.mxu0 %v546_v1 }
  0x3a   :  { %488 = vmatpush3.bf16.msra.mxu0 %v520_v32 }
  0x3b   :  { %489 = vmatprep.subr.bf16.mxu0 %v546_v1 }
  0x3e   :  { %490 = vmatpush3.bf16.msra.mxu0 %v521_v33 }
  0xf4   :  { %v134_v25 = vpop.f32.mrb[0].mxu0 }
  0xf5   :  { %v135_v26 = vadd.f32 %v381_v24, %v134_v25  ;;  %v453_v27 = vpop.f32.mrb[1].mxu0 }
  0xf6   :  { %v137_v28 = vpop.f32.mrb[2].mxu0 }
  0xf7   :  { %v140_v29 = vmax.f32 %v135_v26, 0.0  ;;  %v454_v30 = vpop.f32.mrb[3].mxu0 }
  0xf9   :  { %v141_v31 = vpack.c.bf16 %v140_v29, %v140_v29 }
  0xfb   :  { %472 = vmatmul.mubr.bf16.vlgmr.msra.gmra.mrb[0].mxu1 %v141_v31 }
 0x1ce   :  { %v247_v35 = vpop.f32.mrb[0].mxu1 }
 0x1cf   :  { %v248_v36 = vadd.f32 %v390_v34, %v247_v35  ;;  %v473_v37 = vpop.f32.mrb[1].mxu1 }
 0x1d0   :  { %v250_v38 = vpop.f32.mrb[2].mxu1 }
 0x1d1   :  { %v253_v39 = vmax.f32 %v248_v36, 0.0  ;;  %v474_v40 = vpop.f32.mrb[3].mxu1 }
 0x1d3   :  { %v254_v41 = vpack.c.bf16 %v253_v39, %v253_v39 }
 0x1d5   :  { %492 = vmatmul.mubr.bf16.vlgmr.msra.gmra.mrb[4].mxu0 %v254_v41 }
 0x2a8   :  { %v360_v43 = vpop.f32.mrb[4].mxu0 }
 0x2a9   :  { %v361_v44 = vadd.f32 %v399_v42, %v360_v43  ;;  %v493_v45 = vpop.f32.mrb[5].mxu0 }
 0x2aa   :  { %v363_v46 = vpop.f32.mrb[6].mxu0 }
 0x2ab   :  { %366 = vst [vmem:[#allocation2] sm:$0xff] %v361_v44  ;;  %v494_v47 = vpop.f32.mrb[7].mxu0 }
 0x2ac   :  { %533 = shalt.err (!%p530_p4)
}
 0x2ad   :  { %s534_s6 = scalar_lea.hbm %s722_s7, 128 }
 0x2ae   :  { %p535_p5 = scmp.ne.s32.totalorder %s722_s7, %s534_s6  ;;  %p538_p6 = scmp.lt.u32.totalorder %s534_s6, %s722_s7 }
 0x2b0   :  { %p540_p7 = pnand %p538_p6, %p535_p5 }
 0x2b2   :  { %543 = shalt.err (!%p540_p7)
}
 0x2b3   :  { %376 = dma.vmem_to_hbm [thread:$0]  %s374_s1, 128, %s722_s7, [#allocation3]  }
 0x2b4   :  { %544 = dma.done.wait [#allocation3], 128  }
 0x2b5   :  { %545 = vsyncadd [#allocation3], 4294967168 }
 0x2b6   :  { %380 = vsyncpa [#allocation3], 1 }

</bundles_post_ra>
